<compile_context>
chip_gen: v6e
topology: v6e:2x2x1
jax: 0.10.0
libtpu: 0.0.40
codegen_flags: <defaults>
</compile_context>

<pallas_src>
import jax
import jax.numpy as jnp
from jax.experimental import pallas as pl
from jax.experimental.pallas import tpu as pltpu

_LANES = 128
_BLOCK_ROWS = 512  # up to 512 x 128 elements per grid step


def _identity_kernel(x_ref, o_ref):
    o_ref[...] = x_ref[...]


@jax.jit
def _identity_copy(x):
    """Pallas identity copy of `x` (the sample pass-through of the module)."""
    n = x.size
    nbytes = int(n) * x.dtype.itemsize
    cost = pl.CostEstimate(flops=0, transcendentals=0, bytes_accessed=2 * nbytes)

    if n % _LANES == 0:
        rows = n // _LANES
        slab = x.reshape(rows, _LANES)  # free reshape, no pad / no slice
        # Sublane alignment matching the dtype packing:
        #   uint8 -> 32 rows, bf16/f16 -> 16 rows, f32 -> 8 rows.
        sub = 8 * max(1, 4 // x.dtype.itemsize)
        if rows % sub == 0:
            block_rows = min(_BLOCK_ROWS, rows)
            block_rows -= block_rows % sub  # keep a packing-aligned multiple
        else:
            block_rows = rows  # single full-slab block (always a valid block)
        grid = (pl.cdiv(rows, block_rows),)
        out = pl.pallas_call(
            _identity_kernel,
            out_shape=jax.ShapeDtypeStruct(slab.shape, slab.dtype),
            grid=grid,
            in_specs=[pl.BlockSpec((block_rows, _LANES), lambda i: (i, 0))],
            out_specs=pl.BlockSpec((block_rows, _LANES), lambda i: (i, 0)),
            compiler_params=pltpu.CompilerParams(
                dimension_semantics=("parallel",)),
            cost_estimate=cost,
        )(slab)
        return out.reshape(x.shape)

    # Fallback: tiny / oddly shaped samples -> whole array as one block.
    return pl.pallas_call(
        _identity_kernel,
        out_shape=jax.ShapeDtypeStruct(x.shape, x.dtype),
        cost_estimate=cost,
    )(x)


def clear_target_transform(sample, *args):
    """JAX/Pallas equivalent of ClearTargetTransform.forward."""
    # TODO(synk): PIL.Image.Image samples have no device/Pallas equivalent;
    # only array samples are handled here.
    return _identity_copy(sample), list()


if __name__ == "__main__":
    key = jax.random.PRNGKey(0)
    k1, k2, k3, k4 = jax.random.split(key, 4)

    # float32 image tensor: tiled lane-dense path (rows = 16, block = 16x128).
    img_f32 = jax.random.normal(k1, (2, 4, 16, 16), dtype=jnp.float32)
    out, tgt = clear_target_transform(img_f32, "old_target_to_be_cleared")
    jax.block_until_ready(out)
    assert tgt == []
    assert out.shape == img_f32.shape and out.dtype == img_f32.dtype
    assert jnp.array_equal(out, img_f32), "f32 pass-through mismatch"

    # uint8 image tensor with packing-aligned rows (rows = 64, block = 64x128).
    img_u8 = jax.random.randint(k2, (2, 4, 32, 32), 0, 256,
                                dtype=jnp.int32).astype(jnp.uint8)
    out_u8, tgt_u8 = clear_target_transform(img_u8)
    jax.block_until_ready(out_u8)
    assert tgt_u8 == []
    assert jnp.array_equal(out_u8, img_u8), "u8 pass-through mismatch"

    # uint8 image whose slab rows (12) are below the u8 packing granularity:
    # single full-slab block path.
    img_u8b = jax.random.randint(k3, (2, 3, 16, 16), 0, 256,
                                 dtype=jnp.int32).astype(jnp.uint8)
    out_u8b, tgt_u8b = clear_target_transform(img_u8b)
    jax.block_until_ready(out_u8b)
    assert tgt_u8b == []
    assert jnp.array_equal(out_u8b, img_u8b), "u8 (unaligned rows) mismatch"

    # Oddly sized small tensor (35 elements, not a multiple of 128):
    # whole-array fallback block.
    small = jax.random.normal(k4, (5, 7), dtype=jnp.float32)
    out_s, tgt_s = clear_target_transform(small)
    jax.block_until_ready(out_s)
    assert tgt_s == []
    assert jnp.array_equal(out_s, small), "fallback pass-through mismatch"

    print("KERNEL_OK")
</pallas_src>

<mosaic_0001>
module attributes {stable_mosaic.version = 11 : i64} {
  func.func @_identity_kernel(%arg0: i32, %arg1: memref<16x128xf32, #tpu.memory_space<vmem>>, %arg2: memref<16x128xf32, #tpu.memory_space<vmem>>) attributes {dimension_semantics = [#tpu.dimension_semantics<parallel>], iteration_bounds = array<i64: 1>, scalar_prefetch = 0 : i64, scratch_operands = 0 : i64, tpu.core_type = #tpu.core_type<tc>, window_params = [{transform_indices = @transform_0, window_bounds = array<i64: 16, 128>}, {transform_indices = @transform_1, window_bounds = array<i64: 16, 128>}]} {
    %c0 = arith.constant 0 : index
    %c0_0 = arith.constant 0 : index
    %0 = vector.load %arg1[%c0, %c0_0] : memref<16x128xf32, #tpu.memory_space<vmem>>, vector<16x128xf32>
    %c0_1 = arith.constant 0 : index
    %c0_2 = arith.constant 0 : index
    %1 = vector.load %arg2[%c0_1, %c0_2] : memref<16x128xf32, #tpu.memory_space<vmem>>, vector<16x128xf32>
    tpu.vector_store %arg2[%c0_1, %c0_2], %0 {strides = array<i32>} : memref<16x128xf32, #tpu.memory_space<vmem>>, vector<16x128xf32>,
    return
  }
  func.func @transform_0(%arg0: i32) -> (i32, i32) {
    %c0_i32 = arith.constant 0 : i32
    %c0_i32_0 = arith.constant 0 : i32
    return %arg0, %c0_i32 : i32, i32
  }
  func.func @transform_1(%arg0: i32) -> (i32, i32) {
    %c0_i32 = arith.constant 0 : i32
    %c0_i32_0 = arith.constant 0 : i32
    return %arg0, %c0_i32 : i32, i32
  }
}

</mosaic_0001>

<bundles_post_ra>
// kernel: _identity_copy.1
= control target key start
LH: loop header
LB: loop body
LE: loop exit
PB: predicated region body
PF: predicated region fallthrough
CT: control target
= control target key end

     0   :  { %s38_s0 = inlined_call_operand.vmem [shape: f32[16,128], index: 0, kind: input, shape index: {}]   ;;  %s39_s1 = inlined_call_operand.vmem [shape: f32[16,128], index: 1, kind: output, shape index: {}]  }
   0x1   :  { %v8_v0 = vld [vmem:[%s38_s0] sm:$0xff]  ;;  %v9_v1 = vld [vmem:[%s38_s0 + $0x8] sm:$0xff] }
   0x2   :  { %10 = vst [vmem:[%s39_s1] sm:$0xff] %v8_v0  ;;  %11 = vst [vmem:[%s39_s1 + $0x8] sm:$0xff] %v9_v1 }

</bundles_post_ra>
